<compile_context>
chip_gen: v6e
topology: v6e:2x2x1
jax: 0.10.0
libtpu: 0.0.40
codegen_flags: <defaults>
</compile_context>

<pallas_src>
import jax
import jax.numpy as jnp
from jax.experimental import pallas as pl
from jax.experimental.pallas import tpu as pltpu


def _flatten_copy_kernel(x_ref, o_ref):
    # x_ref / o_ref block: (tN, tD).  Pure lane-dense copy of the flat tile.
    o_ref[...] = x_ref[...]


def _largest_divisor_tile(dim, multiple, cap):
    """Largest divisor of `dim` that is a multiple of `multiple` and <= cap.

    Falls back to the full dim (full-extent blocks bypass the (8,128)
    divisibility requirement and are always legal)."""
    if dim % multiple == 0:
        best = 0
        t = multiple
        limit = min(dim, cap)
        while t <= limit:
            if dim % t == 0:
                best = t
            t += multiple
        if best:
            return best
    return dim


@jax.jit
def flatten(x):
    """Pallas equivalent of torch Flatten: x.contiguous().view(N, -1)."""
    N = x.shape[0]
    D = 1
    for s in x.shape[1:]:
        D *= s

    # Glue: the flatten itself is a metadata-only row-major reshape.
    # (In production the kernel below would be skipped entirely and the
    #  reshape fused into the consumer; it is kept here to provide the
    #  module's forward pass as a Pallas kernel.)
    x2 = x.reshape(N, D)

    # Tile selection: lane-dense last dim (multiple of 128, <= 2048),
    # sublane-aligned batch dim (multiple of 8, <= 256).  Worst case
    # double-buffered in+out footprint: 4 * 256 * 2048 * 4 B = 8 MiB,
    # safe on v5e/v6e/v7x scoped-VMEM defaults.
    tD = _largest_divisor_tile(D, 128, 2048)
    tN = _largest_divisor_tile(N, 8, 256)
    grid = (N // tN, D // tD)

    itemsize = jnp.dtype(x.dtype).itemsize

    out = pl.pallas_call(
        _flatten_copy_kernel,
        out_shape=jax.ShapeDtypeStruct((N, D), x.dtype),
        grid=grid,
        in_specs=[pl.BlockSpec((tN, tD), lambda i, j: (i, j))],
        out_specs=pl.BlockSpec((tN, tD), lambda i, j: (i, j)),
        compiler_params=pltpu.CompilerParams(
            dimension_semantics=("parallel", "parallel"),
        ),
        cost_estimate=pl.CostEstimate(
            flops=0,
            transcendentals=0,
            bytes_accessed=2 * N * D * itemsize,
        ),
    )(x2)
    return out


if __name__ == "__main__":
    # Small deterministic input consistent with train_input.view(N, C, W, 1).
    N, C, W = 2, 4, 16
    key = jax.random.PRNGKey(0)
    x = jax.random.normal(key, (N, C, W, 1), dtype=jnp.float32)

    out = flatten(x)
    out = jax.block_until_ready(out)

    # Correctness check against plain-JAX reshape (== torch .view(N, -1)).
    ref = x.reshape(N, C * W * 1)
    assert out.shape == ref.shape == (N, C * W)
    assert out.dtype == x.dtype
    assert bool(jnp.array_equal(out, ref))

    print("KERNEL_OK")
</pallas_src>

<mosaic_0001>
module attributes {stable_mosaic.version = 11 : i64} {
  func.func @_flatten_copy_kernel(%arg0: i32, %arg1: i32, %arg2: memref<2x64xf32, #tpu.memory_space<vmem>>, %arg3: memref<2x64xf32, #tpu.memory_space<vmem>>) attributes {dimension_semantics = [#tpu.dimension_semantics<parallel>, #tpu.dimension_semantics<parallel>], iteration_bounds = array<i64: 1, 1>, scalar_prefetch = 0 : i64, scratch_operands = 0 : i64, tpu.core_type = #tpu.core_type<tc>, window_params = [{transform_indices = @transform_0, window_bounds = array<i64: 2, 64>}, {transform_indices = @transform_1, window_bounds = array<i64: 2, 64>}]} {
    %c0 = arith.constant 0 : index
    %c0_0 = arith.constant 0 : index
    %0 = vector.load %arg2[%c0, %c0_0] : memref<2x64xf32, #tpu.memory_space<vmem>>, vector<2x64xf32>
    %c0_1 = arith.constant 0 : index
    %c0_2 = arith.constant 0 : index
    %1 = vector.load %arg3[%c0_1, %c0_2] : memref<2x64xf32, #tpu.memory_space<vmem>>, vector<2x64xf32>
    tpu.vector_store %arg3[%c0_1, %c0_2], %0 {strides = array<i32>} : memref<2x64xf32, #tpu.memory_space<vmem>>, vector<2x64xf32>,
    return
  }
  func.func @transform_0(%arg0: i32, %arg1: i32) -> (i32, i32) {
    %c0_i32 = arith.constant 0 : i32
    return %arg0, %arg1 : i32, i32
  }
  func.func @transform_1(%arg0: i32, %arg1: i32) -> (i32, i32) {
    %c0_i32 = arith.constant 0 : i32
    return %arg0, %arg1 : i32, i32
  }
}

</mosaic_0001>

<bundles_post_ra>
// kernel: flatten.1
= control target key start
LH: loop header
LB: loop body
LE: loop exit
PB: predicated region body
PF: predicated region fallthrough
CT: control target
= control target key end

     0   :  { %vm10_vm0 = vcmask 517120   ;;  %s66_s0 = inlined_call_operand.vmem [shape: f32[2,64], index: 0, kind: input, shape index: {}]   ;;  %s67_s1 = inlined_call_operand.hbm [shape: f32[2,64], index: 1, kind: output, shape index: {}]  }
   0x1   :  { %v9_v0 = vld [vmem:[%s66_s0] sm:$0x3] }
   0x2   :  { %6 = vsyncpa [#allocation3], 0  ;;  %11 = vst.msk [vmem:[#allocation2] sm:$0x3] %vm10_vm0, %v9_v0  ;;  %s49_s8 = smov [#allocation2]  }
   0x3   :  { %s18_s9 = sshll.u32 %s49_s8, 4  ;;  %s19_s9 = int_to_ptr.vmem [resolvable:$true] %s18_s9 }
   0x4   :  { %s27_s10 = scalar_lea.vmem %s19_s9, 32  ;;  %p32_p1 = scmp.lt.s32.totalorder %s19_s9, %s19_s9 }
   0x5   :  { %p28_p0 = scmp.ne.s32.totalorder %s19_s9, %s27_s10  ;;  %p33_p2 = scmp.lt.s32.totalorder %s27_s10, %s27_s10 }
   0x7   :  { %p34_p3 = por %p33_p2, %p32_p1 }
   0x9   :  { %p35_p4 = pnand %p34_p3, %p28_p0 }
   0xb   :  { %38 = shalt.err (!%p35_p4)
}
   0xc   :  { %21 = dma.vmem_to_hbm [thread:$0]  %s19_s9, 32, %s67_s1, [#allocation3]  }
   0xd   :  { %47 = dma.done.wait [#allocation3], 32  }
   0xe   :  { %48 = vsyncadd [#allocation3], 4294967264 }
   0xf   :  { %25 = vsyncpa [#allocation3], 1 }

</bundles_post_ra>
